<compile_context>
chip_gen: v6e
topology: v6e:2x2x1
jax: 0.10.0
libtpu: 0.0.40
codegen_flags: <defaults>
</compile_context>

<pallas_src>
import functools

import jax
import jax.numpy as jnp
from jax.experimental import pallas as pl
from jax.experimental.pallas import tpu as pltpu

LN_EPS = 1e-5  # PyTorch nn.LayerNorm default


def _round_up(x, m):
    return ((x + m - 1) // m) * m


def _make_fused_kernel(n_hidden, has_output):
    """Builds a kernel computing the whole network for one batch tile."""

    def kernel(*refs):
        x_ref = refs[0]
        o_ref = refs[-1]
        idx = 1

        h = x_ref[...].astype(jnp.float32)
        for _ in range(n_hidden):
            w_ref, b_ref, g_ref, beta_ref = refs[idx:idx + 4]
            idx += 4
            w = w_ref[...]                                  # stored dtype (f32 or bf16)
            b = b_ref[...].astype(jnp.float32)              # hoisted f32 locals
            g = g_ref[...].astype(jnp.float32)
            beta = beta_ref[...].astype(jnp.float32)

            # MXU matmul in the weight's storage dtype, f32 accumulation.
            y = jnp.dot(h.astype(w.dtype), w,
                        preferred_element_type=jnp.float32) + b

            # LayerNorm over the feature (lane) axis — statistics kept in f32.
            mean = jnp.mean(y, axis=-1, keepdims=True)
            cent = y - mean
            var = jnp.mean(cent * cent, axis=-1, keepdims=True)
            y = cent * jax.lax.rsqrt(var + LN_EPS) * g + beta

            # ReLU (Dropout is identity in eval mode).
            h = jnp.maximum(y, 0.0)

        if has_output:
            w_ref, b_ref = refs[idx:idx + 2]
            # Output projection to 1 column as a lane reduction (no MXU pass).
            w_row = w_ref[...].astype(jnp.float32)          # (1, K_last)
            b_out = b_ref[...].astype(jnp.float32)          # (1, 1)
            out = jnp.sum(h * w_row, axis=-1, keepdims=True) + b_out
            o_ref[...] = out.astype(o_ref.dtype)
        else:
            o_ref[...] = h.astype(o_ref.dtype)

    return kernel


@functools.partial(jax.jit, static_argnames=("tile_m",))
def feedforward_nn(x, params, *, tile_m=128):
    """Fused forward pass of FeedForwardNN as a single pallas_call."""
    M, K = x.shape
    n_hidden = len(params["hidden"])
    has_output = params["output"] is not None
    out_dim = 1 if has_output else params["hidden"][-1][0].shape[1]

    # Batch tile: large (128 default) but never force huge padding for tiny batches.
    tm = min(tile_m, _round_up(M, 8))
    m_pad = _round_up(M, tm)
    if m_pad != M:
        x = jnp.pad(x, ((0, m_pad - M), (0, 0)))

    in_specs = [pl.BlockSpec((tm, K), lambda i: (i, 0))]     # batch-tiled activations
    flat_args = [x]
    for (w, b, g, beta) in params["hidden"]:
        for arr in (w, b, g, beta):
            in_specs.append(pl.BlockSpec(arr.shape, lambda i: (0, 0)))  # full, VMEM-resident
            flat_args.append(arr)
    if has_output:
        w, b = params["output"]
        for arr in (w, b):
            in_specs.append(pl.BlockSpec(arr.shape, lambda i: (0, 0)))
            flat_args.append(arr)

    out = pl.pallas_call(
        _make_fused_kernel(n_hidden, has_output),
        out_shape=jax.ShapeDtypeStruct((m_pad, out_dim), jnp.float32),
        grid_spec=pltpu.PrefetchScalarGridSpec(
            num_scalar_prefetch=0,
            grid=(m_pad // tm,),
            in_specs=in_specs,
            out_specs=pl.BlockSpec((tm, out_dim), lambda i: (i, 0)),
        ),
        compiler_params=pltpu.CompilerParams(
            dimension_semantics=("parallel",)),
    )(*flat_args)

    return out[:M]


def init_feedforward_params(key, in_dim, hidden_layers, include_output=True,
                            dtype=jnp.float32):
    """Deterministic synthetic parameters (shapes match the PyTorch module)."""
    params = {"hidden": [], "output": None}
    dims = [in_dim] + list(hidden_layers)
    for i, h in enumerate(hidden_layers):
        key, k_w, k_b = jax.random.split(key, 3)
        fan_in = dims[i]
        bound = 1.0 / (fan_in ** 0.5)
        w = jax.random.uniform(k_w, (fan_in, h), jnp.float32, -bound, bound).astype(dtype)
        b = jax.random.uniform(k_b, (1, h), jnp.float32, -bound, bound).astype(dtype)
        gamma = jnp.ones((1, h), dtype)
        beta = jnp.zeros((1, h), dtype)
        params["hidden"].append((w, b, gamma, beta))
    if include_output:
        key, k_w, k_b = jax.random.split(key, 3)
        fan_in = hidden_layers[-1]
        bound = 1.0 / (fan_in ** 0.5)
        # Keep PyTorch's (out=1, in=hidden) weight shape -> applied as lane reduction.
        w = jax.random.uniform(k_w, (1, fan_in), jnp.float32, -bound, bound).astype(dtype)
        b = jax.random.uniform(k_b, (1, 1), jnp.float32, -bound, bound).astype(dtype)
        params["output"] = (w, b)
    return params


def _reference(x, params):
    """Pure-JAX reference mirroring the kernel's dtype handling."""
    h = x.astype(jnp.float32)
    for (w, b, g, beta) in params["hidden"]:
        y = jnp.dot(h.astype(w.dtype), w,
                    preferred_element_type=jnp.float32) + b.astype(jnp.float32)
        mean = jnp.mean(y, axis=-1, keepdims=True)
        cent = y - mean
        var = jnp.mean(cent * cent, axis=-1, keepdims=True)
        y = cent * jax.lax.rsqrt(var + LN_EPS) * g.astype(jnp.float32) \
            + beta.astype(jnp.float32)
        h = jnp.maximum(y, 0.0)
    if params["output"] is not None:
        w, b = params["output"]
        h = jnp.sum(h * w.astype(jnp.float32), axis=-1, keepdims=True) \
            + b.astype(jnp.float32)
    return h


if __name__ == "__main__":
    key = jax.random.PRNGKey(0)
    batch, in_dim = 256, 32          # batch=256, tile_m=128 -> 2 parallel grid steps
    hidden_layers = [64, 32]
    dropout_rate = 0.2               # inference mode -> identity

    key, k_x, k_p = jax.random.split(key, 3)
    x = jax.random.normal(k_x, (batch, in_dim), jnp.float32)

    # f32 parameters: exact check against the pure-JAX reference.
    params = init_feedforward_params(k_p, in_dim, hidden_layers,
                                     include_output=True, dtype=jnp.float32)
    out = jax.block_until_ready(feedforward_nn(x, params, tile_m=128))
    ref = _reference(x, params)
    assert out.shape == (batch, 1), out.shape
    assert jnp.allclose(out, ref, atol=1e-4, rtol=1e-4)

    # bf16-stored parameters (fast MXU input path on v6e/v7x); LN stays in f32.
    params_bf16 = jax.tree_util.tree_map(
        lambda a: a.astype(jnp.bfloat16), params)
    out_bf16 = jax.block_until_ready(feedforward_nn(x, params_bf16, tile_m=128))
    ref_bf16 = _reference(x, params_bf16)
    assert out_bf16.shape == (batch, 1), out_bf16.shape
    assert jnp.allclose(out_bf16, ref_bf16, atol=3e-2, rtol=3e-2)

    print("KERNEL_OK")
</pallas_src>

<mosaic_0001>
module attributes {stable_mosaic.version = 11 : i64} {
  func.func @kernel(%arg0: i32, %arg1: memref<128x32xf32, #tpu.memory_space<vmem>>, %arg2: memref<32x64xf32, #tpu.memory_space<vmem>>, %arg3: memref<1x64xf32, #tpu.memory_space<vmem>>, %arg4: memref<1x64xf32, #tpu.memory_space<vmem>>, %arg5: memref<1x64xf32, #tpu.memory_space<vmem>>, %arg6: memref<64x32xf32, #tpu.memory_space<vmem>>, %arg7: memref<1x32xf32, #tpu.memory_space<vmem>>, %arg8: memref<1x32xf32, #tpu.memory_space<vmem>>, %arg9: memref<1x32xf32, #tpu.memory_space<vmem>>, %arg10: memref<1x32xf32, #tpu.memory_space<vmem>>, %arg11: memref<1x1xf32, #tpu.memory_space<vmem>>, %arg12: memref<128x1xf32, #tpu.memory_space<vmem>>) attributes {dimension_semantics = [#tpu.dimension_semantics<parallel>], iteration_bounds = array<i64: 2>, scalar_prefetch = 0 : i64, scratch_operands = 0 : i64, tpu.core_type = #tpu.core_type<tc>, window_params = [{transform_indices = @transform_0, window_bounds = array<i64: 128, 32>}, {pipeline_mode = #tpu.pipeline_mode<synchronous>, transform_indices = @transform_1, window_bounds = array<i64: 32, 64>}, {pipeline_mode = #tpu.pipeline_mode<synchronous>, transform_indices = @transform_2, window_bounds = array<i64: 1, 64>}, {pipeline_mode = #tpu.pipeline_mode<synchronous>, transform_indices = @transform_3, window_bounds = array<i64: 1, 64>}, {pipeline_mode = #tpu.pipeline_mode<synchronous>, transform_indices = @transform_4, window_bounds = array<i64: 1, 64>}, {pipeline_mode = #tpu.pipeline_mode<synchronous>, transform_indices = @transform_5, window_bounds = array<i64: 64, 32>}, {pipeline_mode = #tpu.pipeline_mode<synchronous>, transform_indices = @transform_6, window_bounds = array<i64: 1, 32>}, {pipeline_mode = #tpu.pipeline_mode<synchronous>, transform_indices = @transform_7, window_bounds = array<i64: 1, 32>}, {pipeline_mode = #tpu.pipeline_mode<synchronous>, transform_indices = @transform_8, window_bounds = array<i64: 1, 32>}, {pipeline_mode = #tpu.pipeline_mode<synchronous>, transform_indices = @transform_9, window_bounds = array<i64: 1, 32>}, {pipeline_mode = #tpu.pipeline_mode<synchronous>, transform_indices = @transform_10, window_bounds = array<i64: 1, 1>}, {transform_indices = @transform_11, window_bounds = array<i64: 128, 1>}]} {
    %c0 = arith.constant 0 : index
    %c0_0 = arith.constant 0 : index
    %0 = vector.load %arg1[%c0, %c0_0] : memref<128x32xf32, #tpu.memory_space<vmem>>, vector<128x32xf32>
    %c0_1 = arith.constant 0 : index
    %c0_2 = arith.constant 0 : index
    %1 = vector.load %arg2[%c0_1, %c0_2] : memref<32x64xf32, #tpu.memory_space<vmem>>, vector<32x64xf32>
    %c0_3 = arith.constant 0 : index
    %c0_4 = arith.constant 0 : index
    %2 = vector.load %arg3[%c0_3, %c0_4] : memref<1x64xf32, #tpu.memory_space<vmem>>, vector<1x64xf32>
    %c0_5 = arith.constant 0 : index
    %c0_6 = arith.constant 0 : index
    %3 = vector.load %arg4[%c0_5, %c0_6] : memref<1x64xf32, #tpu.memory_space<vmem>>, vector<1x64xf32>
    %c0_7 = arith.constant 0 : index
    %c0_8 = arith.constant 0 : index
    %4 = vector.load %arg5[%c0_7, %c0_8] : memref<1x64xf32, #tpu.memory_space<vmem>>, vector<1x64xf32>
    %cst = arith.constant dense<0.000000e+00> : vector<128x64xf32>
    %5 = tpu.matmul %0, %1, %cst {dimension_numbers = #tpu.dot_dimension_numbers<[1], [0], [0], [1], [0, 0, 1, 1], [], []>} : vector<128x32xf32>, vector<32x64xf32>, vector<128x64xf32> -> vector<128x64xf32>
    %6 = vector.broadcast %2 : vector<1x64xf32> to vector<128x64xf32>
    %7 = arith.addf %5, %6 : vector<128x64xf32>
    %cst_9 = arith.constant dense<0.000000e+00> : vector<128xf32>
    %8 = vector.multi_reduction <add>, %7, %cst_9 [1] : vector<128x64xf32> to vector<128xf32>
    %9 = vector.shape_cast %8 : vector<128xf32> to vector<128x1xf32>
    %cst_10 = arith.constant 6.400000e+01 : f32
    %10 = vector.broadcast %cst_10 : f32 to vector<128x1xf32>
    %11 = arith.divf %9, %10 : vector<128x1xf32>
    %12 = vector.broadcast %11 : vector<128x1xf32> to vector<128x64xf32>
    %13 = arith.subf %7, %12 : vector<128x64xf32>
    %14 = arith.mulf %13, %13 : vector<128x64xf32>
    %cst_11 = arith.constant dense<0.000000e+00> : vector<128xf32>
    %15 = vector.multi_reduction <add>, %14, %cst_11 [1] : vector<128x64xf32> to vector<128xf32>
    %16 = vector.shape_cast %15 : vector<128xf32> to vector<128x1xf32>
    %cst_12 = arith.constant 6.400000e+01 : f32
    %17 = vector.broadcast %cst_12 : f32 to vector<128x1xf32>
    %18 = arith.divf %16, %17 : vector<128x1xf32>
    %cst_13 = arith.constant 9.99999974E-6 : f32
    %19 = vector.broadcast %cst_13 : f32 to vector<128x1xf32>
    %20 = arith.addf %18, %19 : vector<128x1xf32>
    %21 = math.rsqrt %20 : vector<128x1xf32>
    %22 = vector.broadcast %21 : vector<128x1xf32> to vector<128x64xf32>
    %23 = arith.mulf %13, %22 : vector<128x64xf32>
    %24 = vector.broadcast %3 : vector<1x64xf32> to vector<128x64xf32>
    %25 = arith.mulf %23, %24 : vector<128x64xf32>
    %26 = vector.broadcast %4 : vector<1x64xf32> to vector<128x64xf32>
    %27 = arith.addf %25, %26 : vector<128x64xf32>
    %cst_14 = arith.constant 0.000000e+00 : f32
    %28 = vector.broadcast %cst_14 : f32 to vector<128x64xf32>
    %29 = arith.maximumf %27, %28 : vector<128x64xf32>
    %c0_15 = arith.constant 0 : index
    %c0_16 = arith.constant 0 : index
    %30 = vector.load %arg6[%c0_15, %c0_16] : memref<64x32xf32, #tpu.memory_space<vmem>>, vector<64x32xf32>
    %c0_17 = arith.constant 0 : index
    %c0_18 = arith.constant 0 : index
    %31 = vector.load %arg7[%c0_17, %c0_18] : memref<1x32xf32, #tpu.memory_space<vmem>>, vector<1x32xf32>
    %c0_19 = arith.constant 0 : index
    %c0_20 = arith.constant 0 : index
    %32 = vector.load %arg8[%c0_19, %c0_20] : memref<1x32xf32, #tpu.memory_space<vmem>>, vector<1x32xf32>
    %c0_21 = arith.constant 0 : index
    %c0_22 = arith.constant 0 : index
    %33 = vector.load %arg9[%c0_21, %c0_22] : memref<1x32xf32, #tpu.memory_space<vmem>>, vector<1x32xf32>
    %cst_23 = arith.constant dense<0.000000e+00> : vector<128x32xf32>
    %34 = tpu.matmul %29, %30, %cst_23 {dimension_numbers = #tpu.dot_dimension_numbers<[1], [0], [0], [1], [0, 0, 1, 1], [], []>} : vector<128x64xf32>, vector<64x32xf32>, vector<128x32xf32> -> vector<128x32xf32>
    %35 = vector.broadcast %31 : vector<1x32xf32> to vector<128x32xf32>
    %36 = arith.addf %34, %35 : vector<128x32xf32>
    %cst_24 = arith.constant dense<0.000000e+00> : vector<128xf32>
    %37 = vector.multi_reduction <add>, %36, %cst_24 [1] : vector<128x32xf32> to vector<128xf32>
    %38 = vector.shape_cast %37 : vector<128xf32> to vector<128x1xf32>
    %cst_25 = arith.constant 3.200000e+01 : f32
    %39 = vector.broadcast %cst_25 : f32 to vector<128x1xf32>
    %40 = arith.divf %38, %39 : vector<128x1xf32>
    %41 = vector.broadcast %40 : vector<128x1xf32> to vector<128x32xf32>
    %42 = arith.subf %36, %41 : vector<128x32xf32>
    %43 = arith.mulf %42, %42 : vector<128x32xf32>
    %cst_26 = arith.constant dense<0.000000e+00> : vector<128xf32>
    %44 = vector.multi_reduction <add>, %43, %cst_26 [1] : vector<128x32xf32> to vector<128xf32>
    %45 = vector.shape_cast %44 : vector<128xf32> to vector<128x1xf32>
    %cst_27 = arith.constant 3.200000e+01 : f32
    %46 = vector.broadcast %cst_27 : f32 to vector<128x1xf32>
    %47 = arith.divf %45, %46 : vector<128x1xf32>
    %cst_28 = arith.constant 9.99999974E-6 : f32
    %48 = vector.broadcast %cst_28 : f32 to vector<128x1xf32>
    %49 = arith.addf %47, %48 : vector<128x1xf32>
    %50 = math.rsqrt %49 : vector<128x1xf32>
    %51 = vector.broadcast %50 : vector<128x1xf32> to vector<128x32xf32>
    %52 = arith.mulf %42, %51 : vector<128x32xf32>
    %53 = vector.broadcast %32 : vector<1x32xf32> to vector<128x32xf32>
    %54 = arith.mulf %52, %53 : vector<128x32xf32>
    %55 = vector.broadcast %33 : vector<1x32xf32> to vector<128x32xf32>
    %56 = arith.addf %54, %55 : vector<128x32xf32>
    %cst_29 = arith.constant 0.000000e+00 : f32
    %57 = vector.broadcast %cst_29 : f32 to vector<128x32xf32>
    %58 = arith.maximumf %56, %57 : vector<128x32xf32>
    %c0_30 = arith.constant 0 : index
    %c0_31 = arith.constant 0 : index
    %59 = vector.load %arg10[%c0_30, %c0_31] : memref<1x32xf32, #tpu.memory_space<vmem>>, vector<1x32xf32>
    %c0_32 = arith.constant 0 : index
    %c0_33 = arith.constant 0 : index
    %60 = vector.load %arg11[%c0_32, %c0_33] : memref<1x1xf32, #tpu.memory_space<vmem>>, vector<1x1xf32>
    %61 = vector.broadcast %59 : vector<1x32xf32> to vector<128x32xf32>
    %62 = arith.mulf %58, %61 : vector<128x32xf32>
    %cst_34 = arith.constant dense<0.000000e+00> : vector<128xf32>
    %63 = vector.multi_reduction <add>, %62, %cst_34 [1] : vector<128x32xf32> to vector<128xf32>
    %64 = vector.shape_cast %63 : vector<128xf32> to vector<128x1xf32>
    %65 = vector.broadcast %60 : vector<1x1xf32> to vector<128x1xf32>
    %66 = arith.addf %64, %65 : vector<128x1xf32>
    %c0_35 = arith.constant 0 : index
    %c0_36 = arith.constant 0 : index
    %67 = vector.load %arg12[%c0_35, %c0_36] : memref<128x1xf32, #tpu.memory_space<vmem>>, vector<128x1xf32>
    tpu.vector_store %arg12[%c0_35, %c0_36], %66 {strides = array<i32>} : memref<128x1xf32, #tpu.memory_space<vmem>>, vector<128x1xf32>,
    return
  }
  func.func @transform_0(%arg0: i32) -> (i32, i32) {
    %c0_i32 = arith.constant 0 : i32
    %c0_i32_0 = arith.constant 0 : i32
    return %arg0, %c0_i32 : i32, i32
  }
  func.func @transform_1(%arg0: i32) -> (i32, i32) {
    %c0_i32 = arith.constant 0 : i32
    %c0_i32_0 = arith.constant 0 : i32
    %c0_i32_1 = arith.constant 0 : i32
    return %c0_i32, %c0_i32_0 : i32, i32
  }
  func.func @transform_2(%arg0: i32) -> (i32, i32) {
    %c0_i32 = arith.constant 0 : i32
    %c0_i32_0 = arith.constant 0 : i32
    %c0_i32_1 = arith.constant 0 : i32
    return %c0_i32, %c0_i32_0 : i32, i32
  }
  func.func @transform_3(%arg0: i32) -> (i32, i32) {
    %c0_i32 = arith.constant 0 : i32
    %c0_i32_0 = arith.constant 0 : i32
    %c0_i32_1 = arith.constant 0 : i32
    return %c0_i32, %c0_i32_0 : i32, i32
  }
  func.func @transform_4(%arg0: i32) -> (i32, i32) {
    %c0_i32 = arith.constant 0 : i32
    %c0_i32_0 = arith.constant 0 : i32
    %c0_i32_1 = arith.constant 0 : i32
    return %c0_i32, %c0_i32_0 : i32, i32
  }
  func.func @transform_5(%arg0: i32) -> (i32, i32) {
    %c0_i32 = arith.constant 0 : i32
    %c0_i32_0 = arith.constant 0 : i32
    %c0_i32_1 = arith.constant 0 : i32
    return %c0_i32, %c0_i32_0 : i32, i32
  }
  func.func @transform_6(%arg0: i32) -> (i32, i32) {
    %c0_i32 = arith.constant 0 : i32
    %c0_i32_0 = arith.constant 0 : i32
    %c0_i32_1 = arith.constant 0 : i32
    return %c0_i32, %c0_i32_0 : i32, i32
  }
  func.func @transform_7(%arg0: i32) -> (i32, i32) {
    %c0_i32 = arith.constant 0 : i32
    %c0_i32_0 = arith.constant 0 : i32
    %c0_i32_1 = arith.constant 0 : i32
    return %c0_i32, %c0_i32_0 : i32, i32
  }
  func.func @transform_8(%arg0: i32) -> (i32, i32) {
    %c0_i32 = arith.constant 0 : i32
    %c0_i32_0 = arith.constant 0 : i32
    %c0_i32_1 = arith.constant 0 : i32
    return %c0_i32, %c0_i32_0 : i32, i32
  }
  func.func @transform_9(%arg0: i32) -> (i32, i32) {
    %c0_i32 = arith.constant 0 : i32
    %c0_i32_0 = arith.constant 0 : i32
    %c0_i32_1 = arith.constant 0 : i32
    return %c0_i32, %c0_i32_0 : i32, i32
  }
  func.func @transform_10(%arg0: i32) -> (i32, i32) {
    %c0_i32 = arith.constant 0 : i32
    %c0_i32_0 = arith.constant 0 : i32
    %c0_i32_1 = arith.constant 0 : i32
    return %c0_i32, %c0_i32_0 : i32, i32
  }
  func.func @transform_11(%arg0: i32) -> (i32, i32) {
    %c0_i32 = arith.constant 0 : i32
    %c0_i32_0 = arith.constant 0 : i32
    return %arg0, %c0_i32 : i32, i32
  }
}

</mosaic_0001>

<bundles_post_ra>
// kernel: feedforward_nn.1
= control target key start
LH: loop header
LB: loop body
LE: loop exit
PB: predicated region body
PF: predicated region fallthrough
CT: control target
= control target key end

     0   :  { %s1857_s19 = smov 0   ;;  %s2472_s0 = inlined_call_operand.vmem [shape: f32[256,32], index: 0, kind: input, shape index: {}]   ;;  %s2473_s1 = inlined_call_operand.vmem [shape: f32[32,64], index: 1, kind: input, shape index: {}]   ;;  %s2474_s2 = inlined_call_operand.vmem [shape: f32[1,64], index: 2, kind: input, shape index: {}]   ;;  %s2475_s3 = inlined_call_operand.vmem [shape: f32[1,64], index: 3, kind: input, shape index: {}]   ;;  %s2476_s4 = inlined_call_operand.vmem [shape: f32[1,64], index: 4, kind: input, shape index: {}]   ;;  %s2477_s5 = inlined_call_operand.vmem [shape: f32[64,32], index: 5, kind: input, shape index: {}]   ;;  %s2478_s6 = inlined_call_operand.vmem [shape: f32[1,32], index: 6, kind: input, shape index: {}]   ;;  %s2479_s7 = inlined_call_operand.vmem [shape: f32[1,32], index: 7, kind: input, shape index: {}]   ;;  %s2480_s8 = inlined_call_operand.vmem [shape: f32[1,32], index: 8, kind: input, shape index: {}]   ;;  %s2481_s9 = inlined_call_operand.vmem [shape: f32[1,32], index: 9, kind: input, shape index: {}]   ;;  %s2482_s10 = inlined_call_operand.<no memory space> [shape: f32[1,1], index: 10, kind: input, shape index: {}]   ;;  %s2483_s11 = inlined_call_operand.vmem [shape: f32[256,1], index: 11, kind: output, shape index: {}]  }
   0x1   :  { %v16_v0 = vstv %s2482_s10 }
   0x2   :  { %17 = vst [vmem:[#allocation2] sm:$0x1] %v16_v0 }
   0x3 LB: > { %s1531_s20 = sadd.s32 4294967295, %s1792_s19   ;;  %p1535_p0 = scmp.ge.s32.totalorder %s1792_s19, 1  ;;  %s1792_s19 = sphi %s1857_s19, %s23_s19  }
   0x4   : > { %p340_p1 = scmp.lt.s32.totalorder %s1792_s19, 3 }
   0x6   : > { %p341_p2 = pnand %p1535_p0, %p340_p1 }
   0x7   : > { %s1536_s24 = sshll.u32 (!%p341_p2), %s1531_s20, 4 }
   0x8   : > { %344 = sbr.rel (%p341_p2) target bundleno = 1244 (0x4dc), region = 64  ;;  %p381_p3 = scmp.lt.s32.totalorder (!%p341_p2), %s1536_s24, 31 }
   0xd   : > { %v411_v1 = vld [vmem:[%s2473_s1 + $0x18] sm:$0xff]  ;;  %v410_v2 = vld [vmem:[%s2473_s1 + $0x10] sm:$0xff]  ;;  %v409_v3 = vld [vmem:[%s2473_s1 + $0x8] sm:$0xff]  ;;  %s2485_s24 = smov (!%p381_p3, %s1536_s24), 31  ;;  %vm421_vm0 = vcmask 261120   ;;  %vm615_vm1 = vcmask 523264  }
   0xe   : > { %1626 = vmatprep.subr.mxu0 %v411_v1  ;;  %v408_v4 = vld [vmem:[%s2473_s1] sm:$0xff]  ;;  %s1537_s29 = sshll.u32 %s2485_s24, 3  ;;  %vm1458_vm2 = vcmask 7168  }
   0xf   : > { %1627 = vmatpush3.msra.mxu0 %v411_v1  ;;  %s1885_s13 = scalar_lea.vmem %s2472_s0, %s1537_s29  ;;  %v1540_v24 = vld [vmem:[%s2474_s2] ss:$0 sm:$0xff]  ;;  %s2435_s12 = scalar_lea.vmem %s2483_s11, %s1537_s29 }
  0x10   : > { %1628 = vmatprep.subr.mxu0 %v410_v2  ;;  %v392_v5 = vld [vmem:[%s1885_s13] sm:$0xff]  ;;  %v393_v6 = vld [vmem:[%s1885_s13 + $0x8] sm:$0xff]  ;;  %v394_v7 = vld [vmem:[%s1885_s13 + $0x10] sm:$0xff] }
  0x11   : > { %1629 = vmatpush3.msra.mxu0 %v410_v2  ;;  %1634 = vmatprep.mubr.msk.f32.mxu0 %vm421_vm0, %v392_v5  ;;  %v395_v8 = vld [vmem:[%s1885_s13 + $0x18] sm:$0xff]  ;;  %v396_v9 = vld [vmem:[%s1885_s13 + $0x20] sm:$0xff]  ;;  %v397_v10 = vld [vmem:[%s1885_s13 + $0x28] sm:$0xff] }
  0x12   : > { %1630 = vmatprep.subr.mxu0 %v409_v3  ;;  %v398_v11 = vld [vmem:[%s1885_s13 + $0x30] sm:$0xff]  ;;  %v399_v12 = vld [vmem:[%s1885_s13 + $0x38] sm:$0xff]  ;;  %v400_v13 = vld [vmem:[%s1885_s13 + $0x40] sm:$0xff] }
  0x13   : > { %1631 = vmatpush3.msra.mxu0 %v409_v3  ;;  %v401_v14 = vld [vmem:[%s1885_s13 + $0x48] sm:$0xff]  ;;  %v402_v15 = vld [vmem:[%s1885_s13 + $0x50] sm:$0xff]  ;;  %v403_v16 = vld [vmem:[%s1885_s13 + $0x58] sm:$0xff] }
  0x14   : > { %1632 = vmatprep.subr.mxu0 %v408_v4  ;;  %v404_v17 = vld [vmem:[%s1885_s13 + $0x60] sm:$0xff]  ;;  %v405_v18 = vld [vmem:[%s1885_s13 + $0x68] sm:$0xff]  ;;  %v406_v19 = vld [vmem:[%s1885_s13 + $0x70] sm:$0xff] }
  0x15   : > { %1633 = vmatpush3.msra.mxu0 %v408_v4  ;;  %v407_v20 = vld [vmem:[%s1885_s13 + $0x78] sm:$0xff] }
  0x16   : > { %1635 = vmatmul.mubr.msk.f32.vlgmr.msra.gmra.mxu0 %vm421_vm0, %v393_v6 }
  0x17   : > { %1637 = vmatprep.mubr.msk.f32.mxu0 %vm421_vm0, %v394_v7 }
  0x1a   : > { %1638 = vmatmul.mubr.msk.f32.gmra.mxu0 %vm421_vm0, %v395_v8 }
  0x1b   : > { %1640 = vmatprep.mubr.msk.f32.mxu0 %vm421_vm0, %v396_v9 }
  0x1e   : > { %1641 = vmatmul.mubr.msk.f32.gmra.mxu0 %vm421_vm0, %v397_v10 }
  0x1f   : > { %1643 = vmatprep.mubr.msk.f32.mxu0 %vm421_vm0, %v398_v11 }
  0x22   : > { %1644 = vmatmul.mubr.msk.f32.gmra.mxu0 %vm421_vm0, %v399_v12 }
  0x23   : > { %1646 = vmatprep.mubr.msk.f32.mxu0 %vm421_vm0, %v400_v13 }
  0x26   : > { %1647 = vmatmul.mubr.msk.f32.gmra.mxu0 %vm421_vm0, %v401_v14 }
  0x27   : > { %1649 = vmatprep.mubr.msk.f32.mxu0 %vm421_vm0, %v402_v15 }
  0x2a   : > { %1650 = vmatmul.mubr.msk.f32.gmra.mxu0 %vm421_vm0, %v403_v16 }
  0x2b   : > { %1652 = vmatprep.mubr.msk.f32.mxu0 %vm421_vm0, %v404_v17 }
  0x2e   : > { %1653 = vmatmul.mubr.msk.f32.gmra.mxu0 %vm421_vm0, %v405_v18 }
  0x2f   : > { %1655 = vmatprep.mubr.msk.f32.mxu0 %vm421_vm0, %v406_v19 }
  0x32   : > { %1656 = vmatmul.mubr.msk.f32.gmra.mxu0 %vm421_vm0, %v407_v20 }
  0xd6   : > { %v1636_v21 = vpop.f32.mrf.mxu0 }
  0xd7   : > { %v1974_v0 = vadd.f32 %v1636_v21, %v1540_v24 }
  0xd8   : > { %v536_v22 = vpop.f32.mrf.mxu0 }
  0xd9   : > { %v1966_v59 = vadd.f32 %v1540_v24, %v536_v22  ;;  %v619_v4 = vsel %vm615_vm1, %v1974_v0, 0.0 }
  0xda   : > { %v1639_v23 = vpop.f32.mrf.mxu0 }
  0xdb   : > { %v1924_v28 = vadd.f32 %v1639_v23, %v1540_v24  ;;  %v616_v2 = vsel %vm615_vm1, %v1966_v59, 0.0 }
  0xdc   : > { %v546_v25 = vpop.f32.mrf.mxu0 }
  0xdd   : > { %v1922_v26 = vadd.f32 %v1540_v24, %v546_v25  ;;  %v625_v35 = vsel %vm615_vm1, %v1924_v28, 0.0 }
  0xde   : > { %v1642_v27 = vpop.f32.mrf.mxu0 }
  0xdf   : > { %v1926_v29 = vadd.f32 %v1642_v27, %v1540_v24  ;;  %v622_v30 = vsel %vm615_vm1, %v1922_v26, 0.0 }
  0xe0   : > { %v556_v31 = vpop.f32.mrf.mxu0  ;;  %623 = vadd.xlane.f32.xlu0 %v622_v30 }
  0xe1   : > { %v1930_v32 = vadd.f32 %v1540_v24, %v556_v31  ;;  %v631_v33 = vsel %vm615_vm1, %v1926_v29, 0.0 }
  0xe2   : > { %632 = vadd.xlane.f32.xlu1 %v631_v33  ;;  %v1645_v34 = vpop.f32.mrf.mxu0 }
  0xe3   : > { %v1936_v37 = vadd.f32 %v1645_v34, %v1540_v24  ;;  %v628_v39 = vsel %vm615_vm1, %v1930_v32, 0.0 }
  0xe4   : > { %v566_v36 = vpop.f32.mrf.mxu0  ;;  %626 = vadd.xlane.f32.xlu0 %v625_v35 }
  0xe5   : > { %v1938_v38 = vadd.f32 %v1540_v24, %v566_v36  ;;  %v637_v45 = vsel %vm615_vm1, %v1936_v37, 0.0 }
  0xe6   : > { %v1648_v40 = vpop.f32.mrf.mxu0  ;;  %629 = vadd.xlane.f32.xlu1 %v628_v39 }
  0xe7   : > { %v634_v41 = vsel %vm615_vm1, %v1938_v38, 0.0  ;;  %v1944_v43 = vadd.f32 %v1648_v40, %v1540_v24 }
  0xe8   : > { %v576_v42 = vpop.f32.mrf.mxu0  ;;  %635 = vadd.xlane.f32.xlu0 %v634_v41 }
  0xe9   : > { %v1946_v44 = vadd.f32 %v1540_v24, %v576_v42  ;;  %v643_v51 = vsel %vm615_vm1, %v1944_v43, 0.0 }
  0xea   : > { %v1651_v46 = vpop.f32.mrf.mxu0  ;;  %638 = vadd.xlane.f32.xlu1 %v637_v45 }
  0xeb   : > { %v640_v47 = vsel %vm615_vm1, %v1946_v44, 0.0  ;;  %v1952_v49 = vadd.f32 %v1651_v46, %v1540_v24 }
  0xec   : > { %v586_v48 = vpop.f32.mrf.mxu0  ;;  %641 = vadd.xlane.f32.xlu0 %v640_v47 }
  0xed   : > { %v1954_v50 = vadd.f32 %v1540_v24, %v586_v48  ;;  %v649_v57 = vsel %vm615_vm1, %v1952_v49, 0.0 }
  0xee   : > { %v1654_v52 = vpop.f32.mrf.mxu0  ;;  %644 = vadd.xlane.f32.xlu1 %v643_v51 }
  0xef   : > { %v646_v53 = vsel %vm615_vm1, %v1954_v50, 0.0  ;;  %v1960_v55 = vadd.f32 %v1654_v52, %v1540_v24 }
  0xf0   : > { %v596_v54 = vpop.f32.mrf.mxu0  ;;  %647 = vadd.xlane.f32.xlu0 %v646_v53 }
  0xf1   : > { %v1962_v56 = vadd.f32 %v1540_v24, %v596_v54  ;;  %v655_v63 = vsel %vm615_vm1, %v1960_v55, 0.0 }
  0xf2   : > { %650 = vadd.xlane.f32.xlu1 %v649_v57  ;;  %v1657_v58 = vpop.f32.mrf.mxu0 }
  0xf3   : > { %v652_v60 = vsel %vm615_vm1, %v1962_v56, 0.0  ;;  %v1976_v1 = vadd.f32 %v1657_v58, %v1540_v24 }
  0xf4   : > { %653 = vadd.xlane.f32.xlu0 %v652_v60  ;;  %v606_v61 = vpop.f32.mrf.mxu0 }
  0xf5   : > { %v1970_v62 = vadd.f32 %v1540_v24, %v606_v61  ;;  %v661_v5 = vsel %vm615_vm1, %v1976_v1, 0.0 }
  0xf6   : > { %656 = vadd.xlane.f32.xlu1 %v655_v63 }
  0xf7   : > { %v658_v3 = vsel %vm615_vm1, %v1970_v62, 0.0 }
  0xf8   : > { %617 = vadd.xlane.f32.xlu0 %v616_v2 }
  0xfa   : > { %659 = vadd.xlane.f32.xlu1 %v658_v3 }
  0xfc   : > { %620 = vadd.xlane.f32.xlu0 %v619_v4 }
  0xfe   : > { %662 = vadd.xlane.f32.xlu1 %v661_v5 }
 0x169   : > { %v624_v6 = vpop.xlane.xlu0 %623 }
 0x16a   : > { %v667_v7 = vmul.f32 0.015625, %v624_v6 }
 0x16b   : > { %v633_v8 = vpop.xlane.xlu1 %632 }
 0x16c   : > { %v1987_v9 = vsub.f32 %v1922_v26, %v667_v7  ;;  %v670_v10 = vmul.f32 0.015625, %v633_v8 }
 0x16d   : > { %v627_v11 = vpop.xlane.xlu0 %626 }
 0x16e   : > { %v668_v12 = vmul.f32 0.015625, %v627_v11  ;;  %v699_v13 = vmul.f32 %v1987_v9, %v1987_v9  ;;  %v1992_v14 = vsub.f32 %v1926_v29, %v670_v10 }
 0x16f   : > { %v630_v15 = vpop.xlane.xlu1 %629 }
 0x170   : > { %v1995_v16 = vsub.f32 %v1924_v28, %v668_v12  ;;  %v669_v17 = vmul.f32 0.015625, %v630_v15  ;;  %v719_v18 = vsel %vm615_vm1, %v699_v13, 0.0  ;;  %v702_v24 = vmul.f32 %v1992_v14, %v1992_v14 }
 0x171   : > { %v636_v19 = vpop.xlane.xlu0 %635  ;;  %720 = vadd.xlane.f32.xlu0 %v719_v18 }
 0x172   : > { %v1999_v20 = vsub.f32 %v1930_v32, %v669_v17  ;;  %v671_v21 = vmul.f32 0.015625, %v636_v19  ;;  %v700_v22 = vmul.f32 %v1995_v16, %v1995_v16 }
 0x173   : > { %v639_v23 = vpop.xlane.xlu1 %638 }
 0x174   : > { %v2006_v25 = vsub.f32 %v1938_v38, %v671_v21  ;;  %v672_v26 = vmul.f32 0.015625, %v639_v23  ;;  %v722_v27 = vsel %vm615_vm1, %v700_v22, 0.0  ;;  %v701_v28 = vmul.f32 %v1999_v20, %v1999_v20 }
 0x175   : > { %723 = vadd.xlane.f32.xlu1 %v722_v27  ;;  %v642_v29 = vpop.xlane.xlu0 %641  ;;  %v728_v38 = vsel %vm615_vm1, %v702_v24, 0.0  ;;  %v891_v24 = vld [vmem:[%s2477_s5 + $0x30] sm:$0xff] }
 0x176   : > { %v2012_v30 = vsub.f32 %v1936_v37, %v672_v26  ;;  %v673_v31 = vmul.f32 0.015625, %v642_v29  ;;  %v725_v32 = vsel %vm615_vm1, %v701_v28, 0.0  ;;  %v703_v33 = vmul.f32 %v2006_v25, %v2006_v25  ;;  %v889_v29 = vld [vmem:[%s2477_s5 + $0x20] sm:$0xff] }
 0x177   : > { %v645_v34 = vpop.xlane.xlu1 %644  ;;  %726 = vadd.xlane.f32.xlu0 %v725_v32  ;;  %v888_v32 = vld [vmem:[%s2477_s5 + $0x18] sm:$0xff] }
 0x178   : > { %v2018_v35 = vsub.f32 %v1946_v44, %v673_v31  ;;  %v674_v36 = vmul.f32 0.015625, %v645_v34  ;;  %v704_v39 = vmul.f32 %v2012_v30, %v2012_v30  ;;  %v731_v42 = vsel %vm615_vm1, %v703_v33, 0.0  ;;  %v887_v33 = vld [vmem:[%s2477_s5 + $0x10] sm:$0xff]  ;;  %v886_v34 = vld [vmem:[%s2477_s5 + $0x8] sm:$0xff] }
 0x179   : > { %729 = vadd.xlane.f32.xlu1 %v728_v38  ;;  %v648_v37 = vpop.xlane.xlu0 %647 }
 0x17a   : > { %v2024_v40 = vsub.f32 %v1944_v43, %v674_v36  ;;  %v675_v41 = vmul.f32 0.015625, %v648_v37  ;;  %v705_v45 = vmul.f32 %v2018_v35, %v2018_v35  ;;  %v734_v48 = vsel %vm615_vm1, %v704_v39, 0.0  ;;  %v885_v36 = vld [vmem:[%s2477_s5] sm:$0xff] }
 0x17b   : > { %v651_v46 = vpop.xlane.xlu1 %650  ;;  %732 = vadd.xlane.f32.xlu0 %v731_v42 }
 0x17c   : > { %v2030_v44 = vsub.f32 %v1954_v50, %v675_v41  ;;  %v676_v47 = vmul.f32 0.015625, %v651_v46  ;;  %v706_v51 = vmul.f32 %v2024_v40, %v2024_v40  ;;  %v737_v54 = vsel %vm615_vm1, %v705_v45, 0.0 }
 0x17d   : > { %735 = vadd.xlane.f32.xlu1 %v734_v48  ;;  %v654_v43 = vpop.xlane.xlu0 %653 }
 0x17e   : > { %v2036_v52 = vsub.f32 %v1952_v49, %v676_v47  ;;  %v677_v53 = vmul.f32 0.015625, %v654_v43  ;;  %v707_v57 = vmul.f32 %v2030_v44, %v2030_v44  ;;  %v740_v61 = vsel %vm615_vm1, %v706_v51, 0.0 }
 0x17f   : > { %v657_v58 = vpop.xlane.xlu1 %656  ;;  %738 = vadd.xlane.f32.xlu0 %v737_v54 }
 0x180   : > { %v2042_v50 = vsub.f32 %v1962_v56, %v677_v53  ;;  %v678_v60 = vmul.f32 0.015625, %v657_v58  ;;  %v708_v63 = vmul.f32 %v2036_v52, %v2036_v52  ;;  %v743_v4 = vsel %vm615_vm1, %v707_v57, 0.0 }
 0x181   : > { %741 = vadd.xlane.f32.xlu1 %v740_v61  ;;  %v618_v49 = vpop.xlane.xlu0 %617 }
 0x182   : > { %v2048_v2 = vsub.f32 %v1960_v55, %v678_v60  ;;  %v665_v3 = vmul.f32 0.015625, %v618_v49  ;;  %v709_v5 = vmul.f32 %v2042_v50, %v2042_v50  ;;  %v746_v8 = vsel %vm615_vm1, %v708_v63, 0.0 }
 0x183   : > { %v660_v6 = vpop.xlane.xlu1 %659  ;;  %744 = vadd.xlane.f32.xlu0 %v743_v4 }
 0x184   : > { %v2054_v56 = vsub.f32 %v1966_v59, %v665_v3  ;;  %v679_v7 = vmul.f32 0.015625, %v660_v6  ;;  %v710_v10 = vmul.f32 %v2048_v2, %v2048_v2  ;;  %v749_v13 = vsel %vm615_vm1, %v709_v5, 0.0 }
 0x185   : > { %747 = vadd.xlane.f32.xlu1 %v746_v8  ;;  %v621_v55 = vpop.xlane.xlu0 %620 }
 0x186   : > { %v2060_v11 = vsub.f32 %v1970_v62, %v679_v7  ;;  %v666_v12 = vmul.f32 0.015625, %v621_v55  ;;  %v697_v15 = vmul.f32 %v2054_v56, %v2054_v56  ;;  %v752_v19 = vsel %vm615_vm1, %v710_v10, 0.0  ;;  %v892_v62 = vld [vmem:[%s2477_s5 + $0x38] sm:$0xff]  ;;  %v2109_v10 = vld [vmem:[%s2475_s3] ss:$0 sm:$0xff] }
 0x187   : > { %v663_v17 = vpop.xlane.xlu1 %662  ;;  %750 = vadd.xlane.f32.xlu0 %v749_v13  ;;  %1698 = vmatprep.subr.mxu1 %v892_v62 }
 0x188   : > { %v2066_v59 = vsub.f32 %v1974_v0, %v666_v12  ;;  %v680_v18 = vmul.f32 0.015625, %v663_v17  ;;  %v711_v21 = vmul.f32 %v2060_v11, %v2060_v11  ;;  %v713_v23 = vsel %vm615_vm1, %v697_v15, 0.0  ;;  %1706 = vmatpush3.msra.mxu1 %v892_v62  ;;  %1658 = vmatprep.subr.mxu0 %v892_v62  ;;  %v2115_v17 = vld [vmem:[%s2476_s4] ss:$0 sm:$0xff] }
 0x189   : > { %753 = vadd.xlane.f32.xlu1 %v752_v19  ;;  %1699 = vmatprep.subr.mxu1 %v891_v24 }
 0x18a   : > { %v2075_v22 = vsub.f32 %v1976_v1, %v680_v18  ;;  %v698_v0 = vmul.f32 %v2066_v59, %v2066_v59  ;;  %v755_v26 = vsel %vm615_vm1, %v711_v21, 0.0  ;;  %1707 = vmatpush3.msra.mxu1 %v891_v24  ;;  %v890_v1 = vld [vmem:[%s2477_s5 + $0x28] sm:$0xff]  ;;  %1659 = vmatpush3.msra.mxu0 %v892_v62 }
 0x18b   : > { %714 = vadd.xlane.f32.xlu0 %v713_v23  ;;  %1700 = vmatprep.subr.mxu1 %v890_v1 }
 0x18c   : > { %v712_v27 = vmul.f32 %v2075_v22, %v2075_v22  ;;  %v716_v28 = vsel %vm615_vm1, %v698_v0, 0.0  ;;  %1708 = vmatpush3.msra.mxu1 %v890_v1  ;;  %1660 = vmatprep.subr.mxu0 %v891_v24 }
 0x18d   : > { %756 = vadd.xlane.f32.xlu1 %v755_v26  ;;  %1701 = vmatprep.subr.mxu1 %v889_v29 }
 0x18e   : > { %v758_v31 = vsel %vm615_vm1, %v712_v27, 0.0  ;;  %1709 = vmatpush3.msra.mxu1 %v889_v29  ;;  %1661 = vmatpush3.msra.mxu0 %v891_v24 }
 0x18f   : > { %717 = vadd.xlane.f32.xlu0 %v716_v28  ;;  %1702 = vmatprep.subr.mxu1 %v888_v32 }
 0x190   : > { %1710 = vmatpush3.msra.mxu1 %v888_v32  ;;  %1662 = vmatprep.subr.mxu0 %v890_v1 }
 0x191   : > { %759 = vadd.xlane.f32.xlu1 %v758_v31  ;;  %1703 = vmatprep.subr.mxu1 %v887_v33 }
 0x192   : > { %1663 = vmatpush3.msra.mxu0 %v890_v1  ;;  %1711 = vmatpush3.msra.mxu1 %v887_v33 }
 0x193   : > { %1664 = vmatprep.subr.mxu0 %v889_v29  ;;  %1704 = vmatprep.subr.mxu1 %v886_v34 }
 0x194   : > { %1665 = vmatpush3.msra.mxu0 %v889_v29  ;;  %1712 = vmatpush3.msra.mxu1 %v886_v34 }
 0x195   : > { %1666 = vmatprep.subr.mxu0 %v888_v32  ;;  %1705 = vmatprep.subr.mxu1 %v885_v36 }
 0x196   : > { %1667 = vmatpush3.msra.mxu0 %v888_v32  ;;  %1713 = vmatpush3.msra.mxu1 %v885_v36 }
 0x197   : > { %1668 = vmatprep.subr.mxu0 %v887_v33 }
 0x198   : > { %1669 = vmatpush3.msra.mxu0 %v887_v33 }
 0x199   : > { %1670 = vmatprep.subr.mxu0 %v886_v34 }
 0x19a   : > { %1671 = vmatpush3.msra.mxu0 %v886_v34 }
 0x19b   : > { %1672 = vmatprep.subr.mxu0 %v885_v36 }
 0x19c   : > { %1673 = vmatpush3.msra.mxu0 %v885_v36 }
 0x1fa   : > { %v721_v38 = vpop.xlane.xlu0 %720 }
 0x1fb   : > { %v763_v39 = vmul.f32 0.015625, %v721_v38 }
 0x1fd   : > { %v779_v37 = vadd.f32 1e-05, %v763_v39 }
 0x1fe   : > { %v724_v41 = vpop.xlane.xlu1 %723 }
 0x1ff   : > { %1722 = vrsqrt.f32 %v779_v37  ;;  %v764_v42 = vmul.f32 0.015625, %v724_v41 }
 0x200   : > { %v727_v45 = vpop.xlane.xlu0 %726 }
 0x201   : > { %v780_v46 = vadd.f32 1e-05, %v764_v42  ;;  %v765_v47 = vmul.f32 0.015625, %v727_v45 }
 0x202   : > { %v730_v48 = vpop.xlane.xlu1 %729 }
 0x203   : > { %1724 = vrsqrt.f32 %v780_v46  ;;  %v781_v51 = vadd.f32 1e-05, %v765_v47  ;;  %v766_v43 = vmul.f32 0.015625, %v730_v48 }
 0x204   : > { %v733_v53 = vpop.xlane.xlu0 %732 }
 0x205   : > { %1726 = vrsqrt.f32 %v781_v51  ;;  %v782_v54 = vadd.f32 1e-05, %v766_v43  ;;  %v767_v57 = vmul.f32 0.015625, %v733_v53 }
 0x206   : > { %v736_v58 = vpop.xlane.xlu1 %735 }
 0x207   : > { %1728 = vrsqrt.f32 %v782_v54  ;;  %v783_v60 = vadd.f32 1e-05, %v767_v57  ;;  %v768_v61 = vmul.f32 0.015625, %v736_v58 }
 0x208   : > { %v739_v63 = vpop.xlane.xlu0 %738 }
 0x209   : > { %1730 = vrsqrt.f32 %v783_v60  ;;  %v784_v49 = vadd.f32 1e-05, %v768_v61  ;;  %v769_v3 = vmul.f32 0.015625, %v739_v63 }
 0x20a   : > { %v742_v4 = vpop.xlane.xlu1 %741 }
 0x20b   : > { %1732 = vrsqrt.f32 %v784_v49  ;;  %v785_v5 = vadd.f32 1e-05, %v769_v3  ;;  %v770_v6 = vmul.f32 0.015625, %v742_v4 }
 0x20c   : > { %v1723_v7 = vpop.eup %1722  ;;  %v745_v8 = vpop.xlane.xlu0 %744 }
 0x20d   : > { %1734 = vrsqrt.f32 %v785_v5  ;;  %v786_v55 = vadd.f32 1e-05, %v770_v6  ;;  %v771_v12 = vmul.f32 0.015625, %v745_v8  ;;  %v811_v13 = vmul.f32 %v1723_v7, %v1987_v9 }
 0x20e   : > { %v748_v15 = vpop.xlane.xlu1 %747 }
 0x20f   : > { %1736 = vrsqrt.f32 %v786_v55  ;;  %v787_v18 = vadd.f32 1e-05, %v771_v12  ;;  %v772_v19 = vmul.f32 0.015625, %v748_v15  ;;  %v833_v21 = vmul.f32 %v2109_v10, %v811_v13 }
 0x210   : > { %v1725_v62 = vpop.eup %1724  ;;  %v751_v23 = vpop.xlane.xlu0 %750 }
 0x211   : > { %1738 = vrsqrt.f32 %v787_v18  ;;  %v788_v0 = vadd.f32 1e-05, %v772_v19  ;;  %v773_v24 = vmul.f32 0.015625, %v751_v23  ;;  %v855_v26 = vadd.f32 %v2115_v17, %v833_v21 }
 0x212   : > { %v1727_v27 = vpop.eup %1726  ;;  %v754_v9 = vpop.xlane.xlu1 %753  ;;  %v812_v1 = vmul.f32 %v1725_v62, %v1995_v16 }
 0x213   : > { %1740 = vrsqrt.f32 %v788_v0  ;;  %v789_v28 = vadd.f32 1e-05, %v773_v24  ;;  %v774_v29 = vmul.f32 0.015625, %v754_v9  ;;  %v871_v31 = vmax.f32 %v855_v26, 0.0 }
 0x214   : > { %v1729_v32 = vpop.eup %1728  ;;  %v715_v33 = vpop.xlane.xlu0 %714  ;;  %v834_v34 = vmul.f32 %v2109_v10, %v812_v1  ;;  %v813_v36 = vmul.f32 %v1727_v27, %v1999_v20 }
 0x215   : > { %1742 = vrsqrt.f32 %v789_v28  ;;  %v790_v38 = vadd.f32 1e-05, %v774_v29  ;;  %v761_v39 = vmul.f32 0.015625, %v715_v33  ;;  %1677 = vmatprep.mubr.msk.f32.mxu1 %vm615_vm1, %v871_v31  ;;  %v814_v37 = vmul.f32 %v1729_v32, %v1992_v14 }
 0x216   : > { %v1731_v41 = vpop.eup %1730  ;;  %v757_v42 = vpop.xlane.xlu1 %756  ;;  %v856_v16 = vadd.f32 %v2115_v17, %v834_v34  ;;  %v835_v45 = vmul.f32 %v2109_v10, %v813_v36 }
 0x217   : > { %1744 = vrsqrt.f32 %v790_v38  ;;  %v777_v46 = vadd.f32 1e-05, %v761_v39  ;;  %v775_v47 = vmul.f32 0.015625, %v757_v42  ;;  %v836_v48 = vmul.f32 %v2109_v10, %v814_v37 }
 0x218   : > { %v1733_v51 = vpop.eup %1732  ;;  %v718_v20 = vpop.xlane.xlu0 %717  ;;  %v872_v43 = vmax.f32 %v856_v16, 0.0  ;;  %v857_v53 = vadd.f32 %v2115_v17, %v835_v45  ;;  %v815_v54 = vmul.f32 %v1731_v41, %v2006_v25 }
 0x219   : > { %1746 = vrsqrt.f32 %v777_v46  ;;  %v791_v14 = vadd.f32 1e-05, %v775_v47  ;;  %v762_v57 = vmul.f32 0.015625, %v718_v20  ;;  %v858_v58 = vadd.f32 %v2115_v17, %v836_v48 }
 0x21a   : > { %v1735_v60 = vpop.eup %1734  ;;  %1678 = vmatmul.mubr.msk.f32.vlgmr.msra.gmra.mxu1 %vm615_vm1, %v872_v43  ;;  %v760_v61 = vpop.xlane.xlu1 %759  ;;  %v873_v63 = vmax.f32 %v857_v53, 0.0  ;;  %v837_v49 = vmul.f32 %v2109_v10, %v815_v54  ;;  %v816_v3 = vmul.f32 %v1733_v51, %v2012_v30 }
 0x21b   : > { %1748 = vrsqrt.f32 %v791_v14  ;;  %v778_v4 = vadd.f32 1e-05, %v762_v57  ;;  %v776_v5 = vmul.f32 0.015625, %v760_v61  ;;  %v874_v6 = vmax.f32 %v858_v58, 0.0 }
 0x21c   : > { %v1737_v7 = vpop.eup %1736  ;;  %1680 = vmatprep.mubr.msk.f32.mxu1 %vm615_vm1, %v873_v63  ;;  %v859_v25 = vadd.f32 %v2115_v17, %v837_v49  ;;  %v838_v8 = vmul.f32 %v2109_v10, %v816_v3  ;;  %v817_v55 = vmul.f32 %v1735_v60, %v2018_v35 }
 0x21d   : > { %1750 = vrsqrt.f32 %v778_v4  ;;  %v792_v12 = vadd.f32 1e-05, %v776_v5  ;;  %v818_v13 = vmul.f32 %v1737_v7, %v2024_v40 }
 0x21e   : > { %v1739_v15 = vpop.eup %1738  ;;  %1681 = vmatmul.mubr.msk.f32.gmra.mxu1 %vm615_vm1, %v874_v6  ;;  %v875_v30 = vmax.f32 %v859_v25, 0.0  ;;  %v860_v18 = vadd.f32 %v2115_v17, %v838_v8  ;;  %v839_v19 = vmul.f32 %v2109_v10, %v817_v55 }
 0x21f   : > { %1752 = vrsqrt.f32 %v792_v12  ;;  %v840_v21 = vmul.f32 %v2109_v10, %v818_v13  ;;  %v819_v62 = vmul.f32 %v1739_v15, %v2030_v44 }
 0x220   : > { %v1741_v23 = vpop.eup %1740  ;;  %1683 = vmatprep.mubr.msk.f32.mxu1 %vm615_vm1, %v875_v30  ;;  %v876_v35 = vmax.f32 %v860_v18, 0.0  ;;  %v861_v0 = vadd.f32 %v2115_v17, %v839_v19 }
 0x221   : > { %v862_v40 = vadd.f32 %v2115_v17, %v840_v21  ;;  %v841_v24 = vmul.f32 %v2109_v10, %v819_v62  ;;  %v820_v26 = vmul.f32 %v1741_v23, %v2036_v52 }
 0x222   : > { %v1743_v27 = vpop.eup %1742  ;;  %1684 = vmatmul.mubr.msk.f32.gmra.mxu1 %vm615_vm1, %v876_v35  ;;  %v877_v9 = vmax.f32 %v861_v0, 0.0 }
 0x223   : > { %v878_v1 = vmax.f32 %v862_v40, 0.0  ;;  %v863_v28 = vadd.f32 %v2115_v17, %v841_v24  ;;  %v842_v44 = vmul.f32 %v2109_v10, %v820_v26  ;;  %v821_v29 = vmul.f32 %v1743_v27, %v2042_v50 }
 0x224   : > { %v1745_v31 = vpop.eup %1744  ;;  %1686 = vmatprep.mubr.msk.f32.mxu1 %vm615_vm1, %v877_v9 }
 0x225   : > { %v879_v32 = vmax.f32 %v863_v28, 0.0  ;;  %v864_v33 = vadd.f32 %v2115_v17, %v842_v44  ;;  %v843_v34 = vmul.f32 %v2109_v10, %v821_v29  ;;  %v822_v52 = vmul.f32 %v1745_v31, %v2048_v2 }
 0x226   : > { %v1747_v36 = vpop.eup %1746  ;;  %1687 = vmatmul.mubr.msk.f32.gmra.mxu1 %vm615_vm1, %v878_v1 }
 0x227   : > { %1689 = vmatprep.mubr.msk.f32.mxu1 %vm615_vm1, %v879_v32  ;;  %v880_v38 = vmax.f32 %v864_v33, 0.0  ;;  %v865_v39 = vadd.f32 %v2115_v17, %v843_v34  ;;  %v844_v50 = vmul.f32 %v2109_v10, %v822_v52  ;;  %v809_v37 = vmul.f32 %v1747_v36, %v2054_v56 }
 0x228   : > { %v1749_v41 = vpop.eup %1748 }
 0x229   : > { %v881_v42 = vmax.f32 %v865_v39, 0.0  ;;  %v866_v16 = vadd.f32 %v2115_v17, %v844_v50  ;;  %v831_v45 = vmul.f32 %v2109_v10, %v809_v37  ;;  %v823_v2 = vmul.f32 %v1749_v41, %v2060_v11 }
 0x22a   : > { %v1751_v46 = vpop.eup %1750  ;;  %1690 = vmatmul.mubr.msk.f32.gmra.mxu1 %vm615_vm1, %v880_v38 }
 0x22b   : > { %v810_v47 = vmul.f32 %v1751_v46, %v2066_v59  ;;  %1692 = vmatprep.mubr.msk.f32.mxu1 %vm615_vm1, %v881_v42  ;;  %v882_v48 = vmax.f32 %v866_v16, 0.0  ;;  %v853_v51 = vadd.f32 %v2115_v17, %v831_v45  ;;  %v845_v56 = vmul.f32 %v2109_v10, %v823_v2 }
 0x22c   : > { %v1753_v20 = vpop.eup %1752 }
 0x22d   : > { %v832_v43 = vmul.f32 %v2109_v10, %v810_v47  ;;  %v869_v53 = vmax.f32 %v853_v51, 0.0  ;;  %v867_v54 = vadd.f32 %v2115_v17, %v845_v56  ;;  %v824_v11 = vmul.f32 %v1753_v20, %v2075_v22 }
 0x22e   : > { %1693 = vmatmul.mubr.msk.f32.gmra.mxu1 %vm615_vm1, %v882_v48 }
 0x22f   : > { %1674 = vmatprep.mubr.msk.f32.mxu0 %vm615_vm1, %v869_v53  ;;  %v883_v59 = vmax.f32 %v867_v54, 0.0  ;;  %v854_v14 = vadd.f32 %v2115_v17, %v832_v43  ;;  %v846_v57 = vmul.f32 %v2109_v10, %v824_v11  ;;  %v1559_v10 = vld [vmem:[%s2478_s6] ss:$0 sm:$0xff] }
 0x231   : > { %1695 = vmatprep.mubr.msk.f32.mxu1 %vm615_vm1, %v883_v59  ;;  %v870_v58 = vmax.f32 %v854_v14, 0.0  ;;  %v868_v60 = vadd.f32 %v2115_v17, %v846_v57 }
 0x233   : > { %1675 = vmatmul.mubr.msk.f32.vlgmr.msra.gmra.mxu0 %vm615_vm1, %v870_v58  ;;  %v884_v61 = vmax.f32 %v868_v60, 0.0 }
 0x235   : > { %1696 = vmatmul.mubr.msk.f32.gmra.mxu1 %vm615_vm1, %v884_v61 }
 0x2da   : > { %v1679_v22 = vpop.f32.mrf.mxu1 }
 0x2db   : > { %v2183_v17 = vadd.f32 %v1679_v22, %v1559_v10 }
 0x2dc   : > { %v1026_v63 = vpop.f32.mrf.mxu1 }
 0x2dd   : > { %v2186_v15 = vadd.f32 %v1559_v10, %v1026_v63  ;;  %v1104_v19 = vsel %vm421_vm0, %v2183_v17, 0.0 }
 0x2de   : > { %v1682_v49 = vpop.f32.mrf.mxu1 }
 0x2df   : > { %v2189_v18 = vadd.f32 %v1682_v49, %v1559_v10  ;;  %v1101_v23 = vsel %vm421_vm0, %v2186_v15, 0.0 }
 0x2e0   : > { %v1036_v3 = vpop.f32.mrf.mxu1 }
 0x2e1   : > { %v2193_v62 = vadd.f32 %v1559_v10, %v1036_v3  ;;  %v1110_v0 = vsel %vm421_vm0, %v2189_v18, 0.0 }
 0x2e2   : > { %v1685_v4 = vpop.f32.mrf.mxu1 }
 0x2e3   : > { %v2197_v35 = vadd.f32 %v1685_v4, %v1559_v10  ;;  %v1107_v26 = vsel %vm421_vm0, %v2193_v62, 0.0 }
 0x2e4   : > { %v1046_v5 = vpop.f32.mrf.mxu1 }
 0x2e5   : > { %v2201_v24 = vadd.f32 %v1559_v10, %v1046_v5  ;;  %v1116_v9 = vsel %vm421_vm0, %v2197_v35, 0.0 }
 0x2e6   : > { %v1688_v6 = vpop.f32.mrf.mxu1 }
 0x2e7   : > { %v2205_v27 = vadd.f32 %v1688_v6, %v1559_v10  ;;  %v1113_v44 = vsel %vm421_vm0, %v2201_v24, 0.0 }
 0x2e8   : > { %v1056_v13 = vpop.f32.mrf.mxu1 }
 0x2e9   : > { %v2209_v28 = vadd.f32 %v1559_v10, %v1056_v13  ;;  %v1122_v31 = vsel %vm421_vm0, %v2205_v27, 0.0 }
 0x2ea   : > { %v1691_v21 = vpop.f32.mrf.mxu1 }
 0x2eb   : > { %v2213_v29 = vadd.f32 %v1691_v21, %v1559_v10  ;;  %v1119_v34 = vsel %vm421_vm0, %v2209_v28, 0.0 }
 0x2ec   : > { %v1066_v40 = vpop.f32.mrf.mxu1 }
 0x2ed   : > { %v2217_v33 = vadd.f32 %v1559_v10, %v1066_v40  ;;  %v1128_v38 = vsel %vm421_vm0, %v2213_v29, 0.0 }
 0x2ee   : > { %v1694_v1 = vpop.f32.mrf.mxu1 }
 0x2ef   : > { %v2221_v36 = vadd.f32 %v1694_v1, %v1559_v10  ;;  %v1125_v50 = vsel %vm421_vm0, %v2217_v33, 0.0 }
 0x2f0   : > { %v1076_v32 = vpop.f32.mrf.mxu1 }
 0x2f1   : > { %v2225_v39 = vadd.f32 %v1559_v10, %v1076_v32  ;;  %v1134_v42 = vsel %vm421_vm0, %v2221_v36, 0.0 }
 0x2f3   : > { %v1676_v7 = vpop.f32.mrf.mxu0  ;;  %v1131_v45 = vsel %vm421_vm0, %v2225_v39, 0.0 }
 0x2f4   : > { %v1022_v25 = vadd.f32 %v1676_v7, %v1559_v10 }
 0x2f5   : > { %v1016_v8 = vpop.f32.mrf.mxu0  ;;  %v1697_v52 = vpop.f32.mrf.mxu1 }
 0x2f6   : > { %v1017_v55 = vadd.f32 %v1559_v10, %v1016_v8  ;;  %v1098_v12 = vsel %vm421_vm0, %v1022_v25, 0.0  ;;  %v2229_v41 = vadd.f32 %v1697_v52, %v1559_v10 }
 0x2f7   : > { %1099 = vadd.xlane.f32.xlu1 %v1098_v12  ;;  %v1086_v37 = vpop.f32.mrf.mxu1 }
 0x2f8   : > { %v1095_v30 = vsel %vm421_vm0, %v1017_v55, 0.0  ;;  %v2233_v16 = vadd.f32 %v1559_v10, %v1086_v37  ;;  %v1140_v2 = vsel %vm421_vm0, %v2229_v41, 0.0 }
 0x2f9   : > { %1096 = vadd.xlane.f32.xlu0 %v1095_v30 }
 0x2fa   : > { %v1137_v46 = vsel %vm421_vm0, %v2233_v16, 0.0 }
 0x2fb   : > { %1105 = vadd.xlane.f32.xlu1 %v1104_v19 }
 0x2fd   : > { %1102 = vadd.xlane.f32.xlu0 %v1101_v23 }
 0x2ff   : > { %1111 = vadd.xlane.f32.xlu1 %v1110_v0 }
 0x301   : > { %1108 = vadd.xlane.f32.xlu0 %v1107_v26 }
 0x303   : > { %1117 = vadd.xlane.f32.xlu1 %v1116_v9 }
 0x305   : > { %1114 = vadd.xlane.f32.xlu0 %v1113_v44 }
 0x307   : > { %1123 = vadd.xlane.f32.xlu1 %v1122_v31 }
 0x309   : > { %1120 = vadd.xlane.f32.xlu0 %v1119_v34 }
 0x30b   : > { %1129 = vadd.xlane.f32.xlu1 %v1128_v38 }
 0x30d   : > { %1126 = vadd.xlane.f32.xlu0 %v1125_v50 }
 0x30f   : > { %1135 = vadd.xlane.f32.xlu1 %v1134_v42 }
 0x311   : > { %1132 = vadd.xlane.f32.xlu0 %v1131_v45 }
 0x313   : > { %1141 = vadd.xlane.f32.xlu1 %v1140_v2 }
 0x315   : > { %1138 = vadd.xlane.f32.xlu0 %v1137_v46 }
 0x380   : > { %v1100_v47 = vpop.xlane.xlu1 %1099 }
 0x381   : > { %v1145_v48 = vmul.f32 0.03125, %v1100_v47 }
 0x382   : > { %v1097_v51 = vpop.xlane.xlu0 %1096 }
 0x383   : > { %v2241_v56 = vsub.f32 %v1022_v25, %v1145_v48  ;;  %v1144_v20 = vmul.f32 0.03125, %v1097_v51 }
 0x384   : > { %v1106_v43 = vpop.xlane.xlu1 %1105 }
 0x385   : > { %v2243_v53 = vsub.f32 %v1017_v55, %v1144_v20  ;;  %v1147_v54 = vmul.f32 0.03125, %v1106_v43  ;;  %v1177_v11 = vmul.f32 %v2241_v56, %v2241_v56 }
 0x386   : > { %v1103_v59 = vpop.xlane.xlu0 %1102 }
 0x387   : > { %v2248_v14 = vsub.f32 %v2183_v17, %v1147_v54  ;;  %v1146_v57 = vmul.f32 0.03125, %v1103_v59  ;;  %v1195_v58 = vsel %vm421_vm0, %v1177_v11, 0.0  ;;  %v1176_v60 = vmul.f32 %v2243_v53, %v2243_v53 }
 0x388   : > { %1196 = vadd.xlane.f32.xlu1 %v1195_v58  ;;  %v1112_v61 = vpop.xlane.xlu1 %1111 }
 0x389   : > { %v2254_v22 = vsub.f32 %v2186_v15, %v1146_v57  ;;  %v1149_v63 = vmul.f32 0.03125, %v1112_v61  ;;  %v1192_v49 = vsel %vm421_vm0, %v1176_v60, 0.0  ;;  %v1179_v3 = vmul.f32 %v2248_v14, %v2248_v14 }
 0x38a   : > { %1193 = vadd.xlane.f32.xlu0 %v1192_v49  ;;  %v1109_v4 = vpop.xlane.xlu0 %1108 }
 0x38b   : > { %v2260_v5 = vsub.f32 %v2189_v18, %v1149_v63  ;;  %v1148_v10 = vmul.f32 0.03125, %v1109_v4  ;;  %v1201_v6 = vsel %vm421_vm0, %v1179_v3, 0.0  ;;  %v1178_v7 = vmul.f32 %v2254_v22, %v2254_v22 }
 0x38c   : > { %1202 = vadd.xlane.f32.xlu1 %v1201_v6  ;;  %v1118_v25 = vpop.xlane.xlu1 %1117 }
 0x38d   : > { %v2266_v8 = vsub.f32 %v2193_v62, %v1148_v10  ;;  %v1151_v17 = vmul.f32 0.03125, %v1118_v25  ;;  %v1198_v55 = vsel %vm421_vm0, %v1178_v7, 0.0  ;;  %v1181_v12 = vmul.f32 %v2260_v5, %v2260_v5 }
 0x38e   : > { %1199 = vadd.xlane.f32.xlu0 %v1198_v55  ;;  %v1115_v13 = vpop.xlane.xlu0 %1114 }
 0x38f   : > { %v2272_v15 = vsub.f32 %v2197_v35, %v1151_v17  ;;  %v1150_v30 = vmul.f32 0.03125, %v1115_v13  ;;  %v1207_v18 = vsel %vm421_vm0, %v1181_v12, 0.0  ;;  %v1180_v19 = vmul.f32 %v2266_v8, %v2266_v8 }
 0x390   : > { %1208 = vadd.xlane.f32.xlu1 %v1207_v18  ;;  %v1124_v21 = vpop.xlane.xlu1 %1123 }
 0x391   : > { %v2278_v62 = vsub.f32 %v2201_v24, %v1150_v30  ;;  %v1153_v23 = vmul.f32 0.03125, %v1124_v21  ;;  %v1204_v0 = vsel %vm421_vm0, %v1180_v19, 0.0  ;;  %v1183_v40 = vmul.f32 %v2272_v15, %v2272_v15 }
 0x392   : > { %1205 = vadd.xlane.f32.xlu0 %v1204_v0  ;;  %v1121_v35 = vpop.xlane.xlu0 %1120 }
 0x393   : > { %v2284_v26 = vsub.f32 %v2205_v27, %v1153_v23  ;;  %v1152_v9 = vmul.f32 0.03125, %v1121_v35  ;;  %v1213_v1 = vsel %vm421_vm0, %v1183_v40, 0.0  ;;  %v1182_v44 = vmul.f32 %v2278_v62, %v2278_v62 }
 0x394   : > { %1214 = vadd.xlane.f32.xlu1 %v1213_v1  ;;  %v1130_v24 = vpop.xlane.xlu1 %1129 }
 0x395   : > { %v2290_v31 = vsub.f32 %v2209_v28, %v1152_v9  ;;  %v1155_v32 = vmul.f32 0.03125, %v1130_v24  ;;  %v1210_v34 = vsel %vm421_vm0, %v1182_v44, 0.0  ;;  %v1185_v52 = vmul.f32 %v2284_v26, %v2284_v26 }
 0x396   : > { %1211 = vadd.xlane.f32.xlu0 %v1210_v34  ;;  %v1127_v27 = vpop.xlane.xlu0 %1126 }
 0x397   : > { %v2296_v38 = vsub.f32 %v2213_v29, %v1155_v32  ;;  %v1154_v50 = vmul.f32 0.03125, %v1127_v27  ;;  %v1219_v37 = vsel %vm421_vm0, %v1185_v52, 0.0  ;;  %v1184_v42 = vmul.f32 %v2290_v31, %v2290_v31 }
 0x398   : > { %1220 = vadd.xlane.f32.xlu1 %v1219_v37  ;;  %v1136_v28 = vpop.xlane.xlu1 %1135 }
 0x399   : > { %v2302_v45 = vsub.f32 %v2217_v33, %v1154_v50  ;;  %v1157_v2 = vmul.f32 0.03125, %v1136_v28  ;;  %v1216_v46 = vsel %vm421_vm0, %v1184_v42, 0.0  ;;  %v1187_v47 = vmul.f32 %v2296_v38, %v2296_v38 }
 0x39a   : > { %1217 = vadd.xlane.f32.xlu0 %v1216_v46  ;;  %v1133_v29 = vpop.xlane.xlu0 %1132 }
 0x39b   : > { %v2308_v48 = vsub.f32 %v2221_v36, %v1157_v2  ;;  %v1156_v51 = vmul.f32 0.03125, %v1133_v29  ;;  %v1225_v20 = vsel %vm421_vm0, %v1187_v47, 0.0  ;;  %v1186_v43 = vmul.f32 %v2302_v45, %v2302_v45  ;;  %v2338_v2 = vld [vmem:[%s2479_s7] ss:$0 sm:$0xff] }
 0x39c   : > { %1226 = vadd.xlane.f32.xlu1 %v1225_v20  ;;  %v1142_v33 = vpop.xlane.xlu1 %1141 }
 0x39d   : > { %v2314_v54 = vsub.f32 %v2225_v39, %v1156_v51  ;;  %v1159_v11 = vmul.f32 0.03125, %v1142_v33  ;;  %v1222_v59 = vsel %vm421_vm0, %v1186_v43, 0.0  ;;  %v1189_v57 = vmul.f32 %v2308_v48, %v2308_v48  ;;  %v2344_v43 = vld [vmem:[%s2480_s8] ss:$0 sm:$0xff] }
 0x39e   : > { %1223 = vadd.xlane.f32.xlu0 %v1222_v59  ;;  %v1139_v36 = vpop.xlane.xlu0 %1138 }
 0x39f   : > { %v2320_v58 = vsub.f32 %v2229_v41, %v1159_v11  ;;  %v1158_v60 = vmul.f32 0.03125, %v1139_v36  ;;  %v1231_v61 = vsel %vm421_vm0, %v1189_v57, 0.0  ;;  %v1188_v63 = vmul.f32 %v2314_v54, %v2314_v54 }
 0x3a0   : > { %1232 = vadd.xlane.f32.xlu1 %v1231_v61 }
 0x3a1   : > { %v2326_v39 = vsub.f32 %v2233_v16, %v1158_v60  ;;  %v1228_v49 = vsel %vm421_vm0, %v1188_v63, 0.0  ;;  %v1191_v3 = vmul.f32 %v2320_v58, %v2320_v58 }
 0x3a2   : > { %1229 = vadd.xlane.f32.xlu0 %v1228_v49 }
 0x3a3   : > { %v1237_v4 = vsel %vm421_vm0, %v1191_v3, 0.0  ;;  %v1190_v41 = vmul.f32 %v2326_v39, %v2326_v39 }
 0x3a4   : > { %1238 = vadd.xlane.f32.xlu1 %v1237_v4  ;;  %v2352_v4 = vld [vmem:[%s2481_s9] ss:$0 sm:$0xff] }
 0x3a5   : > { %v1234_v10 = vsel %vm421_vm0, %v1190_v41, 0.0 }
 0x3a6   : > { %1235 = vadd.xlane.f32.xlu0 %v1234_v10 }
 0x411   : > { %v1197_v6 = vpop.xlane.xlu1 %1196 }
 0x412   : > { %v1241_v7 = vmul.f32 0.03125, %v1197_v6 }
 0x413   : > { %v1194_v25 = vpop.xlane.xlu0 %1193 }
 0x414   : > { %v1257_v16 = vadd.f32 1e-05, %v1241_v7  ;;  %v1240_v17 = vmul.f32 0.03125, %v1194_v25 }
 0x415   : > { %v1203_v55 = vpop.xlane.xlu1 %1202 }
 0x416   : > { %1754 = vrsqrt.f32 %v1257_v16  ;;  %v1256_v12 = vadd.f32 1e-05, %v1240_v17  ;;  %v1243_v13 = vmul.f32 0.03125, %v1203_v55 }
 0x417   : > { %v1200_v30 = vpop.xlane.xlu0 %1199 }
 0x418   : > { %1756 = vrsqrt.f32 %v1256_v12  ;;  %v1259_v18 = vadd.f32 1e-05, %v1243_v13  ;;  %v1242_v19 = vmul.f32 0.03125, %v1200_v30 }
 0x419   : > { %v1209_v21 = vpop.xlane.xlu1 %1208 }
 0x41a   : > { %1758 = vrsqrt.f32 %v1259_v18  ;;  %v1258_v23 = vadd.f32 1e-05, %v1242_v19  ;;  %v1245_v0 = vmul.f32 0.03125, %v1209_v21 }
 0x41b   : > { %v1206_v40 = vpop.xlane.xlu0 %1205 }
 0x41c   : > { %1760 = vrsqrt.f32 %v1258_v23  ;;  %v1261_v35 = vadd.f32 1e-05, %v1245_v0  ;;  %v1244_v9 = vmul.f32 0.03125, %v1206_v40 }
 0x41d   : > { %v1215_v1 = vpop.xlane.xlu1 %1214 }
 0x41e   : > { %1762 = vrsqrt.f32 %v1261_v35  ;;  %v1260_v44 = vadd.f32 1e-05, %v1244_v9  ;;  %v1247_v24 = vmul.f32 0.03125, %v1215_v1 }
 0x41f   : > { %v1212_v32 = vpop.xlane.xlu0 %1211 }
 0x420   : > { %1764 = vrsqrt.f32 %v1260_v44  ;;  %v1263_v34 = vadd.f32 1e-05, %v1247_v24  ;;  %v1246_v52 = vmul.f32 0.03125, %v1212_v32 }
 0x421   : > { %v1221_v27 = vpop.xlane.xlu1 %1220 }
 0x422   : > { %1766 = vrsqrt.f32 %v1263_v34  ;;  %v1262_v50 = vadd.f32 1e-05, %v1246_v52  ;;  %v1249_v37 = vmul.f32 0.03125, %v1221_v27 }
 0x423   : > { %v1755_v42 = vpop.eup %1754  ;;  %v1218_v28 = vpop.xlane.xlu0 %1217 }
 0x424   : > { %1768 = vrsqrt.f32 %v1262_v50  ;;  %v1265_v46 = vadd.f32 1e-05, %v1249_v37  ;;  %v1248_v47 = vmul.f32 0.03125, %v1218_v28  ;;  %v1289_v29 = vmul.f32 %v1755_v42, %v2241_v56 }
 0x425   : > { %v1757_v51 = vpop.eup %1756  ;;  %v1227_v20 = vpop.xlane.xlu1 %1226 }
 0x426   : > { %1770 = vrsqrt.f32 %v1265_v46  ;;  %v1264_v33 = vadd.f32 1e-05, %v1248_v47  ;;  %v1251_v11 = vmul.f32 0.03125, %v1227_v20  ;;  %v1311_v59 = vmul.f32 %v2338_v2, %v1289_v29 }
 0x427   : > { %v1759_v57 = vpop.eup %1758  ;;  %v1224_v36 = vpop.xlane.xlu0 %1223  ;;  %v1288_v60 = vmul.f32 %v1757_v51, %v2243_v53 }
 0x428   : > { %1772 = vrsqrt.f32 %v1264_v33  ;;  %v1267_v61 = vadd.f32 1e-05, %v1251_v11  ;;  %v1250_v63 = vmul.f32 0.03125, %v1224_v36  ;;  %v1333_v56 = vadd.f32 %v2344_v43, %v1311_v59 }
 0x429   : > { %v1761_v49 = vpop.eup %1760  ;;  %v1233_v3 = vpop.xlane.xlu1 %1232  ;;  %v1310_v41 = vmul.f32 %v2338_v2, %v1288_v60  ;;  %v1291_v10 = vmul.f32 %v1759_v57, %v2248_v14 }
 0x42a   : > { %1774 = vrsqrt.f32 %v1267_v61  ;;  %v1266_v6 = vadd.f32 1e-05, %v1250_v63  ;;  %v1253_v7 = vmul.f32 0.03125, %v1233_v3  ;;  %v1349_v53 = vmax.f32 %v1333_v56, 0.0 }
 0x42b   : > { %v1763_v25 = vpop.eup %1762  ;;  %v1230_v16 = vpop.xlane.xlu0 %1229  ;;  %v1332_v17 = vadd.f32 %v2344_v43, %v1310_v41  ;;  %v1313_v55 = vmul.f32 %v2338_v2, %v1291_v10  ;;  %v1290_v12 = vmul.f32 %v1761_v49, %v2254_v22 }
 0x42c   : > { %1776 = vrsqrt.f32 %v1266_v6  ;;  %v1269_v13 = vadd.f32 1e-05, %v1253_v7  ;;  %v1252_v30 = vmul.f32 0.03125, %v1230_v16  ;;  %v1373_v18 = vmul.f32 %v2352_v4, %v1349_v53 }
 0x42d   : > { %v1765_v19 = vpop.eup %1764  ;;  %v1239_v21 = vpop.xlane.xlu1 %1238  ;;  %v1348_v14 = vmax.f32 %v1332_v17, 0.0  ;;  %v1335_v23 = vadd.f32 %v2344_v43, %v1313_v55  ;;  %v1312_v0 = vmul.f32 %v2338_v2, %v1290_v12  ;;  %v1293_v40 = vmul.f32 %v1763_v25, %v2260_v5 }
 0x42e   : > { %1778 = vrsqrt.f32 %v1269_v13  ;;  %v1268_v35 = vadd.f32 1e-05, %v1252_v30  ;;  %v1255_v9 = vmul.f32 0.03125, %v1239_v21  ;;  %v1391_v1 = vsel %vm421_vm0, %v1373_v18, 0.0 }
 0x42f   : > { %v1767_v22 = vpop.eup %1766  ;;  %1392 = vadd.xlane.f32.xlu1 %v1391_v1  ;;  %v1236_v44 = vpop.xlane.xlu0 %1235  ;;  %v1372_v24 = vmul.f32 %v2352_v4, %v1348_v14  ;;  %v1351_v32 = vmax.f32 %v1335_v23, 0.0  ;;  %v1334_v34 = vadd.f32 %v2344_v43, %v1312_v0  ;;  %v1315_v52 = vmul.f32 %v2338_v2, %v1293_v40 }
 0x430   : > { %1780 = vrsqrt.f32 %v1268_v35  ;;  %v1271_v27 = vadd.f32 1e-05, %v1255_v9  ;;  %v1254_v50 = vmul.f32 0.03125, %v1236_v44  ;;  %v1292_v5 = vmul.f32 %v1765_v19, %v2266_v8 }
 0x431   : > { %v1769_v37 = vpop.eup %1768  ;;  %v1388_v42 = vsel %vm421_vm0, %v1372_v24, 0.0  ;;  %v1375_v28 = vmul.f32 %v2352_v4, %v1351_v32  ;;  %v1350_v46 = vmax.f32 %v1334_v34, 0.0  ;;  %v1337_v47 = vadd.f32 %v2344_v43, %v1315_v52 }
 0x432   : > { %1782 = vrsqrt.f32 %v1271_v27  ;;  %v1270_v29 = vadd.f32 1e-05, %v1254_v50  ;;  %1389 = vadd.xlane.f32.xlu0 %v1388_v42  ;;  %v1314_v51 = vmul.f32 %v2338_v2, %v1292_v5  ;;  %v1295_v20 = vmul.f32 %v1767_v22, %v2272_v15 }
 0x433   : > { %v1771_v33 = vpop.eup %1770  ;;  %v1397_v11 = vsel %vm421_vm0, %v1375_v28, 0.0  ;;  %v1374_v8 = vmul.f32 %v2352_v4, %v1350_v46  ;;  %v1353_v59 = vmax.f32 %v1337_v47, 0.0  ;;  %v1294_v57 = vmul.f32 %v1769_v37, %v2278_v62 }
 0x434   : > { %1784 = vrsqrt.f32 %v1270_v29  ;;  %1398 = vadd.xlane.f32.xlu1 %v1397_v11  ;;  %v1336_v36 = vadd.f32 %v2344_v43, %v1314_v51  ;;  %v1317_v60 = vmul.f32 %v2338_v2, %v1295_v20  ;;  %v1297_v61 = vmul.f32 %v1771_v33, %v2284_v26 }
 0x435   : > { %v1773_v63 = vpop.eup %1772  ;;  %v1394_v56 = vsel %vm421_vm0, %v1374_v8, 0.0  ;;  %v1377_v15 = vmul.f32 %v2352_v4, %v1353_v59  ;;  %v1316_v49 = vmul.f32 %v2338_v2, %v1294_v57 }
 0x436   : > { %1395 = vadd.xlane.f32.xlu0 %v1394_v56  ;;  %v1352_v3 = vmax.f32 %v1336_v36, 0.0  ;;  %v1339_v41 = vadd.f32 %v2344_v43, %v1317_v60  ;;  %v1319_v62 = vmul.f32 %v2338_v2, %v1297_v61  ;;  %v1296_v10 = vmul.f32 %v1773_v63, %v2290_v31 }
 0x437   : > { %v1775_v6 = vpop.eup %1774  ;;  %v1403_v7 = vsel %vm421_vm0, %v1377_v15, 0.0  ;;  %v1338_v26 = vadd.f32 %v2344_v43, %v1316_v49 }
 0x438   : > { %1404 = vadd.xlane.f32.xlu1 %v1403_v7  ;;  %v1376_v53 = vmul.f32 %v2352_v4, %v1352_v3  ;;  %v1355_v25 = vmax.f32 %v1339_v41, 0.0  ;;  %v1341_v16 = vadd.f32 %v2344_v43, %v1319_v62  ;;  %v1318_v17 = vmul.f32 %v2338_v2, %v1296_v10  ;;  %v1579_v10 = vld [vmem:[#allocation2] ss:$0 sm:$0xff] }
 0x439   : > { %v1777_v55 = vpop.eup %1776  ;;  %v1354_v12 = vmax.f32 %v1338_v26, 0.0  ;;  %v1299_v13 = vmul.f32 %v1775_v6, %v2296_v38 }
 0x43a   : > { %v1400_v30 = vsel %vm421_vm0, %v1376_v53, 0.0  ;;  %v1379_v31 = vmul.f32 %v2352_v4, %v1355_v25  ;;  %v1357_v18 = vmax.f32 %v1341_v16, 0.0  ;;  %v1340_v19 = vadd.f32 %v2344_v43, %v1318_v17 }
 0x43b   : > { %v1779_v21 = vpop.eup %1778  ;;  %1401 = vadd.xlane.f32.xlu0 %v1400_v30  ;;  %v1378_v14 = vmul.f32 %v2352_v4, %v1354_v12  ;;  %v1321_v23 = vmul.f32 %v2338_v2, %v1299_v13  ;;  %v1298_v0 = vmul.f32 %v1777_v55, %v2302_v45 }
 0x43c   : > { %v1409_v40 = vsel %vm421_vm0, %v1379_v31, 0.0  ;;  %v1381_v35 = vmul.f32 %v2352_v4, %v1357_v18  ;;  %v1356_v38 = vmax.f32 %v1340_v19, 0.0  ;;  %v1301_v9 = vmul.f32 %v1779_v21, %v2308_v48 }
 0x43d   : > { %v1781_v1 = vpop.eup %1780  ;;  %1410 = vadd.xlane.f32.xlu1 %v1409_v40  ;;  %v1406_v22 = vsel %vm421_vm0, %v1378_v14, 0.0  ;;  %v1343_v44 = vadd.f32 %v2344_v43, %v1321_v23  ;;  %v1320_v24 = vmul.f32 %v2338_v2, %v1298_v0 }
 0x43e   : > { %v1415_v32 = vsel %vm421_vm0, %v1381_v35, 0.0  ;;  %v1380_v34 = vmul.f32 %v2352_v4, %v1356_v38  ;;  %v1323_v45 = vmul.f32 %v2338_v2, %v1301_v9  ;;  %v1300_v52 = vmul.f32 %v1781_v1, %v2314_v54 }
 0x43f   : > { %v1783_v27 = vpop.eup %1782  ;;  %1407 = vadd.xlane.f32.xlu0 %v1406_v22  ;;  %v1359_v50 = vmax.f32 %v1343_v44, 0.0  ;;  %v1342_v48 = vadd.f32 %v2344_v43, %v1320_v24 }
 0x440   : > { %v1412_v5 = vsel %vm421_vm0, %v1380_v34, 0.0  ;;  %v1345_v37 = vadd.f32 %v2344_v43, %v1323_v45  ;;  %v1322_v42 = vmul.f32 %v2338_v2, %v1300_v52  ;;  %v1303_v28 = vmul.f32 %v1783_v27, %v2320_v58 }
 0x441   : > { %v1785_v46 = vpop.eup %1784  ;;  %1416 = vadd.xlane.f32.xlu1 %v1415_v32  ;;  %v1383_v47 = vmul.f32 %v2352_v4, %v1359_v50  ;;  %v1358_v29 = vmax.f32 %v1342_v48, 0.0 }
 0x442   : > { %v1361_v51 = vmax.f32 %v1345_v37, 0.0  ;;  %v1344_v54 = vadd.f32 %v2344_v43, %v1322_v42  ;;  %v1325_v20 = vmul.f32 %v2338_v2, %v1303_v28  ;;  %v1302_v33 = vmul.f32 %v1785_v46, %v2326_v39 }
 0x443   : > { %1413 = vadd.xlane.f32.xlu0 %v1412_v5  ;;  %v1421_v11 = vsel %vm421_vm0, %v1383_v47, 0.0  ;;  %v1382_v8 = vmul.f32 %v2352_v4, %v1358_v29 }
 0x444   : > { %v1385_v59 = vmul.f32 %v2352_v4, %v1361_v51  ;;  %v1360_v58 = vmax.f32 %v1344_v54, 0.0  ;;  %v1347_v57 = vadd.f32 %v2344_v43, %v1325_v20  ;;  %v1324_v36 = vmul.f32 %v2338_v2, %v1302_v33 }
 0x445   : > { %1422 = vadd.xlane.f32.xlu1 %v1421_v11  ;;  %v1418_v60 = vsel %vm421_vm0, %v1382_v8, 0.0 }
 0x446   : > { %v1427_v61 = vsel %vm421_vm0, %v1385_v59, 0.0  ;;  %v1384_v39 = vmul.f32 %v2352_v4, %v1360_v58  ;;  %v1363_v63 = vmax.f32 %v1347_v57, 0.0  ;;  %v1346_v56 = vadd.f32 %v2344_v43, %v1324_v36 }
 0x447   : > { %1419 = vadd.xlane.f32.xlu0 %v1418_v60 }
 0x448   : > { %v1424_v15 = vsel %vm421_vm0, %v1384_v39, 0.0  ;;  %v1387_v49 = vmul.f32 %v2352_v4, %v1363_v63  ;;  %v1362_v3 = vmax.f32 %v1346_v56, 0.0 }
 0x449   : > { %1428 = vadd.xlane.f32.xlu1 %v1427_v61 }
 0x44a   : > { %v1433_v2 = vsel %vm421_vm0, %v1387_v49, 0.0  ;;  %v1386_v41 = vmul.f32 %v2352_v4, %v1362_v3 }
 0x44b   : > { %1425 = vadd.xlane.f32.xlu0 %v1424_v15 }
 0x44c   : > { %v1430_v62 = vsel %vm421_vm0, %v1386_v41, 0.0 }
 0x44d   : > { %1434 = vadd.xlane.f32.xlu1 %v1433_v2 }
 0x44f   : > { %1431 = vadd.xlane.f32.xlu0 %v1430_v62 }
 0x4b8   : > { %v1393_v43 = vpop.xlane.xlu1 %1392 }
 0x4b9   : > { %v1443_v4 = vadd.f32 %v1579_v10, %v1393_v43 }
 0x4bb   : > { %1460 = vst.msk [vmem:[%s2435_s12 + $0x8] sm:$0xff] %vm1458_vm2, %v1443_v4  ;;  %v1390_v6 = vpop.xlane.xlu0 %1389 }
 0x4bc   : > { %v1442_v7 = vadd.f32 %v1579_v10, %v1390_v6 }
 0x4bd   : > { %v1399_v26 = vpop.xlane.xlu1 %1398 }
 0x4be   : > { %1459 = vst.msk [vmem:[%s2435_s12] sm:$0xff] %vm1458_vm2, %v1442_v7  ;;  %v1445_v53 = vadd.f32 %v1579_v10, %v1399_v26 }
 0x4bf   : > { %v1396_v25 = vpop.xlane.xlu0 %1395 }
 0x4c0   : > { %1462 = vst.msk [vmem:[%s2435_s12 + $0x18] sm:$0xff] %vm1458_vm2, %v1445_v53  ;;  %v1444_v16 = vadd.f32 %v1579_v10, %v1396_v25 }
 0x4c1   : > { %v1405_v17 = vpop.xlane.xlu1 %1404 }
 0x4c2   : > { %1461 = vst.msk [vmem:[%s2435_s12 + $0x10] sm:$0xff] %vm1458_vm2, %v1444_v16  ;;  %v1447_v55 = vadd.f32 %v1579_v10, %v1405_v17 }
 0x4c4   : > { %1464 = vst.msk [vmem:[%s2435_s12 + $0x28] sm:$0xff] %vm1458_vm2, %v1447_v55  ;;  %v1402_v12 = vpop.xlane.xlu0 %1401 }
 0x4c5   : > { %v1446_v13 = vadd.f32 %v1579_v10, %v1402_v12 }
 0x4c6   : > { %v1411_v30 = vpop.xlane.xlu1 %1410 }
 0x4c7   : > { %1463 = vst.msk [vmem:[%s2435_s12 + $0x20] sm:$0xff] %vm1458_vm2, %v1446_v13  ;;  %v1449_v31 = vadd.f32 %v1579_v10, %v1411_v30 }
 0x4c8   : > { %v1408_v18 = vpop.xlane.xlu0 %1407 }
 0x4c9   : > { %1466 = vst.msk [vmem:[%s2435_s12 + $0x38] sm:$0xff] %vm1458_vm2, %v1449_v31  ;;  %v1448_v19 = vadd.f32 %v1579_v10, %v1408_v18 }
 0x4ca   : > { %v1417_v21 = vpop.xlane.xlu1 %1416 }
 0x4cb   : > { %1465 = vst.msk [vmem:[%s2435_s12 + $0x30] sm:$0xff] %vm1458_vm2, %v1448_v19  ;;  %v1451_v14 = vadd.f32 %v1579_v10, %v1417_v21 }
 0x4cc   : > { %v1414_v23 = vpop.xlane.xlu0 %1413 }
 0x4cd   : > { %1468 = vst.msk [vmem:[%s2435_s12 + $0x48] sm:$0xff] %vm1458_vm2, %v1451_v14  ;;  %v1450_v0 = vadd.f32 %v1579_v10, %v1414_v23 }
 0x4ce   : > { %v1423_v40 = vpop.xlane.xlu1 %1422 }
 0x4cf   : > { %1467 = vst.msk [vmem:[%s2435_s12 + $0x40] sm:$0xff] %vm1458_vm2, %v1450_v0  ;;  %v1453_v35 = vadd.f32 %v1579_v10, %v1423_v40 }
 0x4d0   : > { %v1420_v38 = vpop.xlane.xlu0 %1419 }
 0x4d1   : > { %1470 = vst.msk [vmem:[%s2435_s12 + $0x58] sm:$0xff] %vm1458_vm2, %v1453_v35  ;;  %v1452_v9 = vadd.f32 %v1579_v10, %v1420_v38 }
 0x4d2   : > { %v1429_v1 = vpop.xlane.xlu1 %1428 }
 0x4d3   : > { %1469 = vst.msk [vmem:[%s2435_s12 + $0x50] sm:$0xff] %vm1458_vm2, %v1452_v9  ;;  %v1455_v22 = vadd.f32 %v1579_v10, %v1429_v1 }
 0x4d4   : > { %v1426_v44 = vpop.xlane.xlu0 %1425 }
 0x4d5   : > { %1472 = vst.msk [vmem:[%s2435_s12 + $0x68] sm:$0xff] %vm1458_vm2, %v1455_v22  ;;  %v1454_v24 = vadd.f32 %v1579_v10, %v1426_v44 }
 0x4d6   : > { %v1435_v32 = vpop.xlane.xlu1 %1434 }
 0x4d7   : > { %1471 = vst.msk [vmem:[%s2435_s12 + $0x60] sm:$0xff] %vm1458_vm2, %v1454_v24  ;;  %v1457_v34 = vadd.f32 %v1579_v10, %v1435_v32 }
 0x4d8   : > { %v1432_v45 = vpop.xlane.xlu0 %1431 }
 0x4d9   : > { %1474 = vst.msk [vmem:[%s2435_s12 + $0x78] sm:$0xff] %vm1458_vm2, %v1457_v34  ;;  %v1456_v52 = vadd.f32 %v1579_v10, %v1432_v45 }
 0x4db   : > { %1473 = vst.msk [vmem:[%s2435_s12 + $0x70] sm:$0xff] %vm1458_vm2, %v1456_v52 }
 0x4dc PF: > { %s23_s19 = sadd.s32 1, %s1792_s19  }
 0x4dd   : > { %p20_p4 = scmp.ge.s32.totalorder %s23_s19, 4  }
 0x4df   :  { %22 = sbr.rel (!%p20_p4) target bundleno = 3 (0x3), region = 94 }

</bundles_post_ra>
